<compile_context>
chip_gen: v6e
topology: v6e:2x2x1
jax: 0.10.0
libtpu: 0.0.40
codegen_flags: <defaults>
</compile_context>

<pallas_src>
import jax
import jax.numpy as jnp
from jax.experimental import pallas as pl
from jax.experimental.pallas import tpu as pltpu


# ---------------------------------------------------------------------------
# Tile selection
# ---------------------------------------------------------------------------
def _choose_tiles(B, K, N, itemsize):
    """Pick (TB, TN).

    TN: lane-aligned (multiple of 128) exact divisor of N (so reduction tiles
        are never padded with garbage); full N when N is not 128-aligned.
    TB: keep 2 inputs x 2 pipeline buffers under ~12 MiB -> safe for the
        smallest default scoped VMEM (v5e 16 MiB; v6e/v7x 32 MiB).
    """
    budget = 12 * 1024 * 1024  # bytes for double-buffered input tiles

    if N % 128 != 0:
        TN = N
    else:
        TN = 128
        t = 256
        while t <= min(N, 2048):
            if N % t == 0 and 4 * K * t * itemsize <= budget:
                TN = t
            t += 128

    per_row = 4 * K * TN * itemsize          # 2 inputs x 2 buffers, one B row
    tb = max(1, budget // per_row)
    if tb >= B:
        TB = B
    else:
        # (TB, K) output blocks need TB % 8 == 0 when TB != B.
        TB = min(B, max(8, (tb // 8) * 8))
    return TB, TN


# ---------------------------------------------------------------------------
# Streaming kernel: running max / sum over N, per (TB, K) row block.
# ---------------------------------------------------------------------------
def _scae_stream_kernel(a_k_ref, a_kn_ref, gauss_ref,
                        prior_ref, vb_ref,
                        max_acc, sum_acc):
    n = pl.program_id(1)

    @pl.when(n == 0)
    def _init():
        max_acc[...] = jnp.full_like(max_acc, -jnp.inf)
        sum_acc[...] = jnp.zeros_like(sum_acc)

    # One load of each tile, reused for both the max and the product; cast to
    # f32 in-register so bf16/f16 inputs accumulate in full precision.
    x = a_kn_ref[...].astype(jnp.float32)     # (TB, K, TN)
    g = gauss_ref[...].astype(jnp.float32)    # (TB, K, TN)

    max_acc[...] = jnp.maximum(max_acc[...], jnp.max(x, axis=-1))
    sum_acc[...] = sum_acc[...] + jnp.sum(x * g, axis=-1)

    @pl.when(n == pl.num_programs(1) - 1)
    def _emit_rows():
        a_k = a_k_ref[...].astype(jnp.float32)          # (TB, K)
        prior_ref[...] = a_k * max_acc[...]             # a_k_prior rows
        vb_ref[...] = a_k * sum_acc[...]                # v_b rows


# ---------------------------------------------------------------------------
# Finalize kernel: tiny (B, K) epilogue -> scalar loss.
# ---------------------------------------------------------------------------
def _entropy_mean(x, axis):
    # mean over the non-reduced axis of  -sum(softmax(x) * log_softmax(x))
    # using  h = log(s) - sum(e*z)/s   (no explicit p / logp tensors).
    m = jnp.max(x, axis=axis, keepdims=True)
    z = x - m
    e = jnp.exp(z)
    s = jnp.sum(e, axis=axis, keepdims=True)
    h = jnp.log(s) - jnp.sum(e * z, axis=axis, keepdims=True) / s
    return jnp.mean(h)


def _scae_finalize_kernel(scal_ref, prior_ref, vb_ref, o_ref):
    # scal_ref (SMEM, (1, 4)): [img_lik, part_lik, b_c, k_c]
    img_lik = scal_ref[0, 0]
    part_lik = scal_ref[0, 1]
    b_c = scal_ref[0, 2]
    k_c = scal_ref[0, 3]

    a_k_prior = prior_ref[...]      # (B, K) f32
    v_b = vb_ref[...]               # (B, K) f32

    # prior sparsity
    l_11 = jnp.mean((jnp.sum(a_k_prior, axis=-1) - k_c) ** 2)   # mean over B
    l_12 = jnp.mean((jnp.sum(a_k_prior, axis=0) - b_c) ** 2)    # mean over K
    prior_sparsity = l_11 + l_12

    # posterior sparsity: entropy(v_b.T) - entropy(v_b)
    ent_vk = _entropy_mean(v_b, axis=0)     # softmax over B, mean over K
    ent_vb = _entropy_mean(v_b, axis=-1)    # softmax over K, mean over B
    posterior_sparsity = ent_vk - ent_vb

    o_ref[0, 0] = (-img_lik - part_lik
                   + prior_sparsity + 10.0 * posterior_sparsity)


# ---------------------------------------------------------------------------
# Wrapper
# ---------------------------------------------------------------------------
def scae_loss(img_lik, part_lik, a_k, a_kn, gaussian, b_c, k_c):
    """Pallas implementation of SCAE_LOSS.forward.

    img_lik, part_lik, b_c, k_c : scalars
    a_k      : (B, K, 1)     (any float dtype)
    a_kn     : (B, K, N)     (any float dtype)
    gaussian : (B, K, N)     (any float dtype)
    returns scalar loss (float32)
    """
    B, K, _ = a_k.shape
    N = a_kn.shape[-1]

    a_k2 = a_k[..., 0]                      # squeeze(-1); native dtype
    itemsize = jnp.dtype(a_kn.dtype).itemsize
    TB, TN = _choose_tiles(B, K, N, itemsize)
    grid = (pl.cdiv(B, TB), pl.cdiv(N, TN))

    prior, vb = pl.pallas_call(
        _scae_stream_kernel,
        out_shape=(jax.ShapeDtypeStruct((B, K), jnp.float32),
                   jax.ShapeDtypeStruct((B, K), jnp.float32)),
        grid_spec=pltpu.PrefetchScalarGridSpec(
            num_scalar_prefetch=0,
            grid=grid,
            in_specs=[
                pl.BlockSpec((TB, K), lambda b, n: (b, 0)),
                pl.BlockSpec((TB, K, TN), lambda b, n: (b, 0, n)),
                pl.BlockSpec((TB, K, TN), lambda b, n: (b, 0, n)),
            ],
            out_specs=[
                pl.BlockSpec((TB, K), lambda b, n: (b, 0)),
                pl.BlockSpec((TB, K), lambda b, n: (b, 0)),
            ],
            scratch_shapes=[pltpu.VMEM((TB, K), jnp.float32),
                            pltpu.VMEM((TB, K), jnp.float32)],
        ),
        compiler_params=pltpu.CompilerParams(
            dimension_semantics=("parallel", "arbitrary")),
    )(a_k2, a_kn, gaussian)

    scalars = jnp.stack(
        [jnp.asarray(img_lik, jnp.float32),
         jnp.asarray(part_lik, jnp.float32),
         jnp.asarray(b_c, jnp.float32),
         jnp.asarray(k_c, jnp.float32)]
    ).reshape(1, 4)

    out = pl.pallas_call(
        _scae_finalize_kernel,
        out_shape=jax.ShapeDtypeStruct((1, 1), jnp.float32),
        grid=(1,),
        in_specs=[
            pl.BlockSpec((1, 4), lambda i: (0, 0), memory_space=pltpu.SMEM),
            pl.BlockSpec((B, K), lambda i: (0, 0)),
            pl.BlockSpec((B, K), lambda i: (0, 0)),
        ],
        out_specs=pl.BlockSpec((1, 1), lambda i: (0, 0)),
        compiler_params=pltpu.CompilerParams(
            dimension_semantics=("arbitrary",)),
    )(scalars, prior, vb)
    return out[0, 0]


# ---------------------------------------------------------------------------
# Pure-JAX reference mirroring the PyTorch module.
# ---------------------------------------------------------------------------
def scae_loss_ref(img_lik, part_lik, a_k, a_kn, gaussian, b_c, k_c):
    def entropy(x):
        p = jax.nn.softmax(x, axis=-1)
        logp = jax.nn.log_softmax(x, axis=-1)
        return jnp.mean(-jnp.sum(p * logp, axis=-1))

    a_k_prior = a_k[..., 0] * jnp.max(a_kn, axis=-1)
    a_kn_post = a_k * (a_kn * gaussian)
    l_11 = jnp.mean((jnp.sum(a_k_prior, axis=-1) - k_c) ** 2)
    l_12 = jnp.mean((jnp.sum(a_k_prior, axis=0) - b_c) ** 2)
    prior_sparsity = l_11 + l_12
    v_b = jnp.sum(a_kn_post, axis=-1)
    v_k = v_b.T
    posterior_sparsity = entropy(v_k) - entropy(v_b)
    return -img_lik - part_lik + prior_sparsity + 10 * posterior_sparsity


if __name__ == "__main__":
    key = jax.random.PRNGKey(0)
    kA, kB, kC, kD, kE = jax.random.split(key, 5)

    B, K, N = 8, 16, 128   # batch, num capsules, num parts

    img_lik = jax.random.normal(kA, (), dtype=jnp.float32)
    part_lik = jax.random.normal(kB, (), dtype=jnp.float32)
    a_k = jax.random.uniform(kC, (B, K, 1), dtype=jnp.float32)
    a_kn = jax.random.uniform(kD, (B, K, N), dtype=jnp.float32)
    gaussian = jax.random.uniform(kE, (B, K, N), dtype=jnp.float32)
    b_c = jnp.float32(2.0)
    k_c = jnp.float32(1.0)

    loss = scae_loss(img_lik, part_lik, a_k, a_kn, gaussian, b_c, k_c)
    jax.block_until_ready(loss)

    ref = scae_loss_ref(img_lik, part_lik, a_k, a_kn, gaussian, b_c, k_c)
    assert jnp.allclose(loss, ref, rtol=1e-4, atol=1e-4), (loss, ref)

    print("KERNEL_OK")
</pallas_src>

<mosaic_0001>
module attributes {stable_mosaic.version = 11 : i64} {
  func.func @_scae_stream_kernel(%arg0: i32, %arg1: i32, %arg2: memref<8x16xf32, #tpu.memory_space<vmem>>, %arg3: memref<8x16x128xf32, #tpu.memory_space<vmem>>, %arg4: memref<8x16x128xf32, #tpu.memory_space<vmem>>, %arg5: memref<8x16xf32, #tpu.memory_space<vmem>>, %arg6: memref<8x16xf32, #tpu.memory_space<vmem>>, %arg7: memref<8x16xf32, #tpu.memory_space<vmem>>, %arg8: memref<8x16xf32, #tpu.memory_space<vmem>>) attributes {dimension_semantics = [#tpu.dimension_semantics<parallel>, #tpu.dimension_semantics<arbitrary>], iteration_bounds = array<i64: 1, 1>, scalar_prefetch = 0 : i64, scratch_operands = 2 : i64, tpu.core_type = #tpu.core_type<tc>, window_params = [{transform_indices = @transform_0, window_bounds = array<i64: 8, 16>}, {transform_indices = @transform_1, window_bounds = array<i64: 8, 16, 128>}, {transform_indices = @transform_2, window_bounds = array<i64: 8, 16, 128>}, {transform_indices = @transform_3, window_bounds = array<i64: 8, 16>}, {transform_indices = @transform_4, window_bounds = array<i64: 8, 16>}]} {
    %c0_i32 = arith.constant 0 : i32
    %0 = arith.cmpi eq, %arg1, %c0_i32 : i32
    %1 = arith.extui %0 : i1 to i32
    %c0_i32_0 = arith.constant 0 : i32
    %2 = arith.cmpi ne, %1, %c0_i32_0 : i32
    scf.if %2 {
      %cst_17 = arith.constant 0xFF800000 : f32
      %17 = vector.broadcast %cst_17 : f32 to vector<8x16xf32>
      %c0_18 = arith.constant 0 : index
      %c0_19 = arith.constant 0 : index
      %18 = vector.load %arg7[%c0_18, %c0_19] : memref<8x16xf32, #tpu.memory_space<vmem>>, vector<8x16xf32>
      tpu.vector_store %arg7[%c0_18, %c0_19], %17 {strides = array<i32>} : memref<8x16xf32, #tpu.memory_space<vmem>>, vector<8x16xf32>,
      %cst_20 = arith.constant 0.000000e+00 : f32
      %19 = vector.broadcast %cst_20 : f32 to vector<8x16xf32>
      %c0_21 = arith.constant 0 : index
      %c0_22 = arith.constant 0 : index
      %20 = vector.load %arg8[%c0_21, %c0_22] : memref<8x16xf32, #tpu.memory_space<vmem>>, vector<8x16xf32>
      tpu.vector_store %arg8[%c0_21, %c0_22], %19 {strides = array<i32>} : memref<8x16xf32, #tpu.memory_space<vmem>>, vector<8x16xf32>,
    } else {
    }
    %c0 = arith.constant 0 : index
    %c0_1 = arith.constant 0 : index
    %c0_2 = arith.constant 0 : index
    %3 = vector.load %arg3[%c0, %c0_1, %c0_2] : memref<8x16x128xf32, #tpu.memory_space<vmem>>, vector<8x16x128xf32>
    %c0_3 = arith.constant 0 : index
    %c0_4 = arith.constant 0 : index
    %c0_5 = arith.constant 0 : index
    %4 = vector.load %arg4[%c0_3, %c0_4, %c0_5] : memref<8x16x128xf32, #tpu.memory_space<vmem>>, vector<8x16x128xf32>
    %c0_6 = arith.constant 0 : index
    %c0_7 = arith.constant 0 : index
    %5 = vector.load %arg7[%c0_6, %c0_7] : memref<8x16xf32, #tpu.memory_space<vmem>>, vector<8x16xf32>
    %cst = arith.constant dense<0xFF800000> : vector<8x16xf32>
    %6 = vector.multi_reduction <maximumf>, %3, %cst [2] : vector<8x16x128xf32> to vector<8x16xf32>
    %7 = arith.maximumf %5, %6 : vector<8x16xf32>
    %c0_8 = arith.constant 0 : index
    %c0_9 = arith.constant 0 : index
    %8 = vector.load %arg7[%c0_8, %c0_9] : memref<8x16xf32, #tpu.memory_space<vmem>>, vector<8x16xf32>
    tpu.vector_store %arg7[%c0_8, %c0_9], %7 {strides = array<i32>} : memref<8x16xf32, #tpu.memory_space<vmem>>, vector<8x16xf32>,
    %c0_10 = arith.constant 0 : index
    %c0_11 = arith.constant 0 : index
    %9 = vector.load %arg8[%c0_10, %c0_11] : memref<8x16xf32, #tpu.memory_space<vmem>>, vector<8x16xf32>
    %10 = arith.mulf %3, %4 : vector<8x16x128xf32>
    %cst_12 = arith.constant dense<0.000000e+00> : vector<8x16xf32>
    %11 = vector.multi_reduction <add>, %10, %cst_12 [2] : vector<8x16x128xf32> to vector<8x16xf32>
    %12 = arith.addf %9, %11 : vector<8x16xf32>
    %c0_13 = arith.constant 0 : index
    %c0_14 = arith.constant 0 : index
    %13 = vector.load %arg8[%c0_13, %c0_14] : memref<8x16xf32, #tpu.memory_space<vmem>>, vector<8x16xf32>
    tpu.vector_store %arg8[%c0_13, %c0_14], %12 {strides = array<i32>} : memref<8x16xf32, #tpu.memory_space<vmem>>, vector<8x16xf32>,
    %c0_i32_15 = arith.constant 0 : i32
    %14 = arith.cmpi eq, %arg1, %c0_i32_15 : i32
    %15 = arith.extui %14 : i1 to i32
    %c0_i32_16 = arith.constant 0 : i32
    %16 = arith.cmpi ne, %15, %c0_i32_16 : i32
    scf.if %16 {
      %c0_17 = arith.constant 0 : index
      %c0_18 = arith.constant 0 : index
      %17 = vector.load %arg2[%c0_17, %c0_18] : memref<8x16xf32, #tpu.memory_space<vmem>>, vector<8x16xf32>
      %c0_19 = arith.constant 0 : index
      %c0_20 = arith.constant 0 : index
      %18 = vector.load %arg7[%c0_19, %c0_20] : memref<8x16xf32, #tpu.memory_space<vmem>>, vector<8x16xf32>
      %19 = arith.mulf %17, %18 : vector<8x16xf32>
      %c0_21 = arith.constant 0 : index
      %c0_22 = arith.constant 0 : index
      %20 = vector.load %arg5[%c0_21, %c0_22] : memref<8x16xf32, #tpu.memory_space<vmem>>, vector<8x16xf32>
      tpu.vector_store %arg5[%c0_21, %c0_22], %19 {strides = array<i32>} : memref<8x16xf32, #tpu.memory_space<vmem>>, vector<8x16xf32>,
      %c0_23 = arith.constant 0 : index
      %c0_24 = arith.constant 0 : index
      %21 = vector.load %arg8[%c0_23, %c0_24] : memref<8x16xf32, #tpu.memory_space<vmem>>, vector<8x16xf32>
      %22 = arith.mulf %17, %21 : vector<8x16xf32>
      %c0_25 = arith.constant 0 : index
      %c0_26 = arith.constant 0 : index
      %23 = vector.load %arg6[%c0_25, %c0_26] : memref<8x16xf32, #tpu.memory_space<vmem>>, vector<8x16xf32>
      tpu.vector_store %arg6[%c0_25, %c0_26], %22 {strides = array<i32>} : memref<8x16xf32, #tpu.memory_space<vmem>>, vector<8x16xf32>,
    } else {
    }
    return
  }
  func.func @transform_0(%arg0: i32, %arg1: i32) -> (i32, i32) {
    %c0_i32 = arith.constant 0 : i32
    %c0_i32_0 = arith.constant 0 : i32
    return %arg0, %c0_i32 : i32, i32
  }
  func.func @transform_1(%arg0: i32, %arg1: i32) -> (i32, i32, i32) {
    %c0_i32 = arith.constant 0 : i32
    %c0_i32_0 = arith.constant 0 : i32
    return %arg0, %c0_i32, %arg1 : i32, i32, i32
  }
  func.func @transform_2(%arg0: i32, %arg1: i32) -> (i32, i32, i32) {
    %c0_i32 = arith.constant 0 : i32
    %c0_i32_0 = arith.constant 0 : i32
    return %arg0, %c0_i32, %arg1 : i32, i32, i32
  }
  func.func @transform_3(%arg0: i32, %arg1: i32) -> (i32, i32) {
    %c0_i32 = arith.constant 0 : i32
    %c0_i32_0 = arith.constant 0 : i32
    return %arg0, %c0_i32 : i32, i32
  }
  func.func @transform_4(%arg0: i32, %arg1: i32) -> (i32, i32) {
    %c0_i32 = arith.constant 0 : i32
    %c0_i32_0 = arith.constant 0 : i32
    return %arg0, %c0_i32 : i32, i32
  }
}

</mosaic_0001>

<bundles_post_ra>
// kernel: tpu_custom_call.1
= control target key start
LH: loop header
LB: loop body
LE: loop exit
PB: predicated region body
PF: predicated region fallthrough
CT: control target
= control target key end

     0   :  { %10 = vsyncpa [#allocation5], 0  ;;  %s691_s0 = inlined_call_operand.hbm [shape: f32[8,16], index: 0, kind: input, shape index: {}]   ;;  %s692_s1 = inlined_call_operand.hbm [shape: f32[8,16,128], index: 1, kind: input, shape index: {}]   ;;  %s693_s2 = inlined_call_operand.hbm [shape: f32[8,16,128], index: 2, kind: input, shape index: {}]   ;;  %s694_s3 = inlined_call_operand.hbm [shape: f32[8,16], index: 3, kind: output, shape index: {0}]   ;;  %s695_s4 = inlined_call_operand.hbm [shape: f32[8,16], index: 4, kind: output, shape index: {1}]  }
   0x1   :  { %11 = vsyncpa [#allocation8], 0 }
   0x2   :  { %12 = vsyncpa [#allocation6], 0 }
   0x3   :  { %13 = vsyncpa [#allocation12], 0  ;;  %s543_s15 = smov [#allocation7]  }
   0x4   :  { %s29_s16 = sshll.u32 %s543_s15, 4  ;;  %s30_s16 = int_to_ptr.vmem [resolvable:$true] %s29_s16 }
   0x5   :  { %s443_s17 = scalar_lea.vmem %s30_s16, 2048  ;;  %p448_p1 = scmp.lt.s32.totalorder %s30_s16, %s30_s16 }
   0x6   :  { %p444_p0 = scmp.ne.s32.totalorder %s30_s16, %s443_s17  ;;  %p449_p2 = scmp.lt.s32.totalorder %s443_s17, %s443_s17 }
   0x8   :  { %p450_p3 = por %p449_p2, %p448_p1 }
   0xa   :  { %p451_p4 = pnand %p450_p3, %p444_p0 }
   0xc   :  { %454 = shalt.err (!%p451_p4)
}
   0xd   :  { %s544_s18 = smov 128   ;;  %s545_s19 = smov 8  }
   0xe   :  { %35 = dma.hbm_to_vmem [thread:$0]  %s692_s1, 2048, %s30_s16, [#allocation8], %s544_s18, %s544_s18, %s545_s19  }
   0xf   :  { %s546_s22 = smov [#allocation4]   ;;  %s547_s24 = smov [#allocation9]  }
  0x10   :  { %s20_s23 = sshll.u32 %s546_s22, 4  ;;  %s41_s25 = sshll.u32 %s547_s24, 4  ;;  %s21_s23 = int_to_ptr.vmem [resolvable:$true] %s20_s23  ;;  %s42_s25 = int_to_ptr.vmem [resolvable:$true] %s41_s25 }
  0x11   :  { %s463_s26 = scalar_lea.vmem %s21_s23, 128  ;;  %p468_p6 = scmp.lt.s32.totalorder %s21_s23, %s21_s23 }
  0x12   :  { %p464_p5 = scmp.ne.s32.totalorder %s21_s23, %s463_s26  ;;  %p469_p7 = scmp.lt.s32.totalorder %s463_s26, %s463_s26 }
  0x14   :  { %p470_p8 = por %p469_p7, %p468_p6 }
  0x16   :  { %p471_p9 = pnand %p470_p8, %p464_p5 }
  0x18   :  { %474 = shalt.err (!%p471_p9)
}
  0x19   :  { %23 = dma.hbm_to_vmem [thread:$0]  %s691_s0, 128, %s21_s23, [#allocation5]  }
  0x1a   :  { %s483_s29 = scalar_lea.vmem %s42_s25, 2048  ;;  %p488_p11 = scmp.lt.s32.totalorder %s42_s25, %s42_s25 }
  0x1b   :  { %p484_p10 = scmp.ne.s32.totalorder %s42_s25, %s483_s29  ;;  %p489_p12 = scmp.lt.s32.totalorder %s483_s29, %s483_s29 }
  0x1d   :  { %p490_p13 = por %p489_p12, %p488_p11 }
  0x1f   :  { %p491_p0 = pnand %p490_p13, %p484_p10 }
  0x21   :  { %494 = shalt.err (!%p491_p0)
}
  0x22   :  { %47 = dma.hbm_to_vmem [thread:$0]  %s693_s2, 2048, %s42_s25, [#allocation8], %s544_s18, %s544_s18, %s545_s19  }
  0x23   :  { %535 = dma.done.wait [#allocation5], 128  }
  0x24   :  { %536 = vsyncadd [#allocation5], 4294967168 }
  0x25   :  { %537 = dma.done.wait [#allocation8], 4096  }
  0x26   :  { %538 = vsyncadd [#allocation8], 4294963200  ;;  %v66_v0 = vld [vmem:[#allocation7 + $0x10] sm:$0xff]  ;;  %v64_v1 = vld [vmem:[#allocation7] sm:$0xff]  ;;  %vm61_vm0 = vcmask 130048   ;;  %v548_v48 = vmov -inf  }
  0x27   :  { %101 = vmax.xlane.f32.xlu1 %v66_v0  ;;  %97 = vmax.xlane.f32.xlu0 %v64_v1  ;;  %v67_v2 = vld [vmem:[#allocation7 + $0x18] sm:$0xff]  ;;  %v65_v3 = vld [vmem:[#allocation7 + $0x8] sm:$0xff]  ;;  %v80_v5 = vld [vmem:[#allocation9] sm:$0xff]  ;;  %62 = vst.msk [vmem:[#allocation2] sm:$0xff] %vm61_vm0, %v548_v48  ;;  %v549_v49 = vmov 0.0   ;;  %vm156_vm1 = vcmask 130112  }
  0x28   :  { %v81_v4 = vld [vmem:[#allocation9 + $0x8] sm:$0xff]  ;;  %v240_v7 = vmul.f32 %v80_v5, %v64_v1  ;;  %v83_v8 = vld [vmem:[#allocation9 + $0x18] sm:$0xff]  ;;  %v82_v9 = vld [vmem:[#allocation9 + $0x10] sm:$0xff]  ;;  %63 = vst.msk [vmem:[#allocation3] sm:$0xff] %vm61_vm0, %v549_v49  ;;  %vm221_vm2 = vcmask 1041409   ;;  %vm223_vm3 = vcmask 1042434  }
  0x29   :  { %v241_v6 = vmul.f32 %v81_v4, %v65_v3  ;;  %v243_v10 = vmul.f32 %v83_v8, %v67_v2  ;;  %v242_v11 = vmul.f32 %v82_v9, %v66_v0  ;;  %v69_v12 = vld [vmem:[#allocation7 + $0x28] sm:$0xff]  ;;  %v68_v13 = vld [vmem:[#allocation7 + $0x20] sm:$0xff]  ;;  %v71_v18 = vld [vmem:[#allocation7 + $0x38] sm:$0xff]  ;;  %vm225_vm4 = vcmask 1043459   ;;  %s550_s0 = smov [#allocation10]   ;;  %s551_s5 = smov [#allocation11]  }
  0x2a   :  { %v85_v14 = vld [vmem:[#allocation9 + $0x28] sm:$0xff]  ;;  %v84_v15 = vld [vmem:[#allocation9 + $0x20] sm:$0xff]  ;;  %v70_v19 = vld [vmem:[#allocation7 + $0x30] sm:$0xff]  ;;  %vm227_vm5 = vcmask 1044484   ;;  %vm229_vm6 = vcmask 1045509   ;;  %vm231_vm7 = vcmask 1046534  }
  0x2b   :  { %103 = vmax.xlane.f32.xlu1 %v67_v2  ;;  %99 = vmax.xlane.f32.xlu0 %v65_v3  ;;  %v245_v16 = vmul.f32 %v85_v14, %v69_v12  ;;  %v244_v17 = vmul.f32 %v84_v15, %v68_v13  ;;  %v87_v20 = vld [vmem:[#allocation9 + $0x38] sm:$0xff]  ;;  %v86_v21 = vld [vmem:[#allocation9 + $0x30] sm:$0xff]  ;;  %v73_v24 = vld [vmem:[#allocation7 + $0x48] sm:$0xff]  ;;  %v145_v2 = vlaneseq  ;;  %vm233_vm8 = vcmask 1047559   ;;  %s402_s2 = sshll.u32 %s550_s0, 4  ;;  %s412_s6 = sshll.u32 %s551_s5, 4  ;;  %s403_s2 = int_to_ptr.vmem [resolvable:$true] %s402_s2  ;;  %s413_s6 = int_to_ptr.vmem [resolvable:$true] %s412_s6 }
  0x2c   :  { %v247_v22 = vmul.f32 %v87_v20, %v71_v18  ;;  %v246_v23 = vmul.f32 %v86_v21, %v70_v19  ;;  %v72_v25 = vld [vmem:[#allocation7 + $0x40] sm:$0xff]  ;;  %v89_v26 = vld [vmem:[#allocation9 + $0x48] sm:$0xff]  ;;  %v75_v30 = vld [vmem:[#allocation7 + $0x58] sm:$0xff]  ;;  %s495_s7 = scalar_lea.vmem %s403_s2, 128  ;;  %p500_p2 = scmp.lt.s32.totalorder %s403_s2, %s403_s2 }
  0x2d   :  { %v88_v27 = vld [vmem:[#allocation9 + $0x40] sm:$0xff]  ;;  %v249_v28 = vmul.f32 %v89_v26, %v73_v24  ;;  %v74_v31 = vld [vmem:[#allocation7 + $0x50] sm:$0xff]  ;;  %v91_v32 = vld [vmem:[#allocation9 + $0x58] sm:$0xff]  ;;  %v146_v5 = vand.u32 127, %v145_v2  ;;  %v148_v9 = vshrl.u32 %v145_v2, 7  ;;  %p496_p1 = scmp.ne.s32.totalorder %s403_s2, %s495_s7  ;;  %p501_p3 = scmp.lt.s32.totalorder %s495_s7, %s495_s7 }
  0x2e   :  { %v248_v29 = vmul.f32 %v88_v27, %v72_v25  ;;  %v90_v33 = vld [vmem:[#allocation9 + $0x50] sm:$0xff]  ;;  %v251_v34 = vmul.f32 %v91_v32, %v75_v30  ;;  %v77_v36 = vld [vmem:[#allocation7 + $0x68] sm:$0xff]  ;;  %v76_v37 = vld [vmem:[#allocation7 + $0x60] sm:$0xff] }
  0x2f   :  { %258 = vadd.xlane.f32.xlu1 %v241_v6  ;;  %256 = vadd.xlane.f32.xlu0 %v240_v7  ;;  %v250_v35 = vmul.f32 %v90_v33, %v74_v31  ;;  %v93_v38 = vld [vmem:[#allocation9 + $0x68] sm:$0xff]  ;;  %v92_v39 = vld [vmem:[#allocation9 + $0x60] sm:$0xff]  ;;  %v79_v42 = vld [vmem:[#allocation7 + $0x78] sm:$0xff]  ;;  %v151_v6 = vadd.s32 4294967288, %v146_v5  ;;  %p502_p4 = por %p501_p3, %p500_p2 }
  0x30   :  { %v253_v40 = vmul.f32 %v93_v38, %v77_v36  ;;  %v252_v41 = vmul.f32 %v92_v39, %v76_v37  ;;  %v78_v43 = vld [vmem:[#allocation7 + $0x70] sm:$0xff]  ;;  %v95_v44 = vld [vmem:[#allocation9 + $0x78] sm:$0xff] }
  0x31   :  { %v94_v45 = vld [vmem:[#allocation9 + $0x70] sm:$0xff]  ;;  %v255_v46 = vmul.f32 %v95_v44, %v79_v42  ;;  %p503_p5 = pnand %p502_p4, %p496_p1 }
  0x32   :  { %v254_v47 = vmul.f32 %v94_v45, %v78_v43 }
  0x33   :  { %262 = vadd.xlane.f32.xlu1 %v243_v10  ;;  %260 = vadd.xlane.f32.xlu0 %v242_v11  ;;  %v602_v10 = vsub.s32 %v151_v6, %v148_v9  ;;  %v96_v6 = vld [vmem:[#allocation2] sm:$0xff] }
  0x37   :  { %107 = vmax.xlane.f32.xlu1 %v69_v12  ;;  %105 = vmax.xlane.f32.xlu0 %v68_v13  ;;  %v604_v13 = vsub.s32 %v146_v5, %v148_v9 }
  0x3b   :  { %266 = vadd.xlane.f32.xlu1 %v245_v16  ;;  %264 = vadd.xlane.f32.xlu0 %v244_v17 }
  0x3f   :  { %111 = vmax.xlane.f32.xlu1 %v71_v18  ;;  %109 = vmax.xlane.f32.xlu0 %v70_v19 }
  0x43   :  { %270 = vadd.xlane.f32.xlu1 %v247_v22  ;;  %268 = vadd.xlane.f32.xlu0 %v246_v23 }
  0x47   :  { %115 = vmax.xlane.f32.xlu1 %v73_v24  ;;  %113 = vmax.xlane.f32.xlu0 %v72_v25 }
  0x4b   :  { %274 = vadd.xlane.f32.xlu1 %v249_v28  ;;  %272 = vadd.xlane.f32.xlu0 %v248_v29 }
  0x4f   :  { %119 = vmax.xlane.f32.xlu1 %v75_v30  ;;  %117 = vmax.xlane.f32.xlu0 %v74_v31 }
  0x53   :  { %278 = vadd.xlane.f32.xlu1 %v251_v34  ;;  %276 = vadd.xlane.f32.xlu0 %v250_v35 }
  0x57   :  { %123 = vmax.xlane.f32.xlu1 %v77_v36  ;;  %121 = vmax.xlane.f32.xlu0 %v76_v37 }
  0x5b   :  { %282 = vadd.xlane.f32.xlu1 %v253_v40  ;;  %280 = vadd.xlane.f32.xlu0 %v252_v41 }
  0x5f   :  { %127 = vmax.xlane.f32.xlu1 %v79_v42  ;;  %125 = vmax.xlane.f32.xlu0 %v78_v43 }
  0x63   :  { %286 = vadd.xlane.f32.xlu1 %v255_v46  ;;  %284 = vadd.xlane.f32.xlu0 %v254_v47 }
  0xb0   :  { %v102_v50 = vpop.xlane.xlu1 %101  ;;  %v98_v51 = vpop.xlane.xlu0 %97 }
  0xb1   :  { %v161_v18 = vrot.slane %v102_v50, %v604_v13  ;;  %v150_v19 = vrot.slane %v98_v51, %v604_v13 }
  0xb4   :  { %v104_v52 = vpop.xlane.xlu1 %103  ;;  %v100_v53 = vpop.xlane.xlu0 %99 }
  0xb5   :  { %v165_v14 = vrot.slane %v104_v52, %v602_v10  ;;  %v155_v15 = vrot.slane %v100_v53, %v602_v10 }
  0xb7   :  { %v166_v22 = vsel %vm156_vm1, %v165_v14, %v161_v18  ;;  %v157_v23 = vsel %vm156_vm1, %v155_v15, %v150_v19 }
  0xb8   :  { %v259_v54 = vpop.xlane.xlu1 %258  ;;  %v257_v55 = vpop.xlane.xlu0 %256  ;;  %v222_v39 = vsel %vm221_vm2, %v166_v22, %v157_v23  ;;  %v239_v23 = vld [vmem:[#allocation3] sm:$0xff] }
  0xb9   :  { %v311_v24 = vrot.slane %v259_v54, %v602_v10  ;;  %v307_v25 = vrot.slane %v257_v55, %v604_v13 }
  0xbb   :  { %v312_v40 = vsel %vm156_vm1, %v311_v24, %v307_v25 }
  0xbc   :  { %v588_v56 = vpop.xlane.xlu1 %262  ;;  %v261_v57 = vpop.xlane.xlu0 %260 }
  0xbd   :  { %v320_v28 = vrot.slane %v588_v56, %v602_v10  ;;  %v316_v29 = vrot.slane %v261_v57, %v604_v13 }
  0xbf   :  { %v321_v45 = vsel %vm156_vm1, %v320_v28, %v316_v29  ;;  %v389_v28 = vld [vmem:[#allocation4] sm:$0xff] }
  0xc0   :  { %v108_v58 = vpop.xlane.xlu1 %107  ;;  %v106_v59 = vpop.xlane.xlu0 %105 }
  0xc1   :  { %v174_v20 = vrot.slane %v108_v58, %v602_v10  ;;  %v170_v21 = vrot.slane %v106_v59, %v604_v13 }
  0xc3   :  { %v175_v32 = vsel %vm156_vm1, %v174_v20, %v170_v21 }
  0xc4   :  { %v590_v60 = vpop.xlane.xlu1 %266  ;;  %v592_v61 = vpop.xlane.xlu0 %264  ;;  %v224_v49 = vsel %vm223_vm3, %v175_v32, %v222_v39 }
  0xc5   :  { %v329_v35 = vrot.slane %v590_v60, %v602_v10  ;;  %v325_v36 = vrot.slane %v592_v61, %v604_v13 }
  0xc7   :  { %v330_v53 = vsel %vm156_vm1, %v329_v35, %v325_v36 }
  0xc8   :  { %v112_v62 = vpop.xlane.xlu1 %111  ;;  %v110_v63 = vpop.xlane.xlu0 %109 }
  0xc9   :  { %v183_v30 = vrot.slane %v112_v62, %v602_v10  ;;  %v179_v31 = vrot.slane %v110_v63, %v604_v13 }
  0xcb   :  { %v184_v46 = vsel %vm156_vm1, %v183_v30, %v179_v31 }
  0xcc   :  { %v594_v0 = vpop.xlane.xlu1 %270  ;;  %v596_v1 = vpop.xlane.xlu0 %268  ;;  %v226_v57 = vsel %vm225_vm4, %v184_v46, %v224_v49 }
  0xcd   :  { %v338_v47 = vrot.slane %v594_v0, %v602_v10  ;;  %v334_v48 = vrot.slane %v596_v1, %v604_v13 }
  0xcf   :  { %v339_v63 = vsel %vm156_vm1, %v338_v47, %v334_v48 }
  0xd0   :  { %v116_v3 = vpop.xlane.xlu1 %115  ;;  %v114_v4 = vpop.xlane.xlu0 %113 }
  0xd1   :  { %v192_v33 = vrot.slane %v116_v3, %v602_v10  ;;  %v188_v34 = vrot.slane %v114_v4, %v604_v13  ;;  %v376_v3 = vsel %vm221_vm2, %v321_v45, %v312_v40 }
  0xd3   :  { %v193_v50 = vsel %vm156_vm1, %v192_v33, %v188_v34 }
  0xd4   :  { %v598_v7 = vpop.xlane.xlu1 %274  ;;  %v600_v8 = vpop.xlane.xlu0 %272  ;;  %v228_v0 = vsel %vm227_vm5, %v193_v50, %v226_v57 }
  0xd5   :  { %v347_v51 = vrot.slane %v598_v7, %v602_v10  ;;  %v343_v52 = vrot.slane %v600_v8, %v604_v13  ;;  %v377_v7 = vsel %vm223_vm3, %v330_v53, %v376_v3 }
  0xd7   :  { %v348_v4 = vsel %vm156_vm1, %v347_v51, %v343_v52 }
  0xd8   :  { %v120_v11 = vpop.xlane.xlu1 %119  ;;  %v118_v12 = vpop.xlane.xlu0 %117 }
  0xd9   :  { %v201_v37 = vrot.slane %v120_v11, %v602_v10  ;;  %v197_v38 = vrot.slane %v118_v12, %v604_v13  ;;  %v378_v12 = vsel %vm225_vm4, %v339_v63, %v377_v7 }
  0xda   :  { %v379_v18 = vsel %vm227_vm5, %v348_v4, %v378_v12 }
  0xdb   :  { %v202_v54 = vsel %vm156_vm1, %v201_v37, %v197_v38 }
  0xdc   :  { %v608_v16 = vpop.xlane.xlu1 %278  ;;  %v610_v17 = vpop.xlane.xlu0 %276  ;;  %v230_v5 = vsel %vm229_vm6, %v202_v54, %v228_v0 }
  0xdd   :  { %v356_v55 = vrot.slane %v608_v16, %v602_v10  ;;  %v352_v56 = vrot.slane %v610_v17, %v604_v13 }
  0xdf   :  { %v357_v8 = vsel %vm156_vm1, %v356_v55, %v352_v56 }
  0xe0   :  { %v124_v26 = vpop.xlane.xlu1 %123  ;;  %v122_v27 = vpop.xlane.xlu0 %121  ;;  %v380_v22 = vsel %vm229_vm6, %v357_v8, %v379_v18 }
  0xe1   :  { %v210_v41 = vrot.slane %v124_v26, %v602_v10  ;;  %v206_v42 = vrot.slane %v122_v27, %v604_v13 }
  0xe3   :  { %v211_v58 = vsel %vm156_vm1, %v210_v41, %v206_v42 }
  0xe4   :  { %v283_v43 = vpop.xlane.xlu1 %282  ;;  %v281_v44 = vpop.xlane.xlu0 %280  ;;  %v232_v9 = vsel %vm231_vm7, %v211_v58, %v230_v5 }
  0xe5   :  { %v365_v59 = vrot.slane %v283_v43, %v602_v10  ;;  %v361_v60 = vrot.slane %v281_v44, %v604_v13 }
  0xe7   :  { %v366_v14 = vsel %vm156_vm1, %v365_v59, %v361_v60 }
  0xe8   :  { %v128_v61 = vpop.xlane.xlu1 %127  ;;  %v126_v62 = vpop.xlane.xlu0 %125  ;;  %v381_v24 = vsel %vm231_vm7, %v366_v14, %v380_v22 }
  0xe9   :  { %v219_v1 = vrot.slane %v128_v61, %v602_v10  ;;  %v215_v2 = vrot.slane %v126_v62, %v604_v13 }
  0xeb   :  { %v220_v11 = vsel %vm156_vm1, %v219_v1, %v215_v2 }
  0xec   :  { %v234_v15 = vsel %vm233_vm8, %v220_v11, %v232_v9  ;;  %v287_v16 = vpop.xlane.xlu1 %286  ;;  %v285_v17 = vpop.xlane.xlu0 %284 }
  0xed   :  { %v236_v19 = vmax.f32 %v96_v6, %v234_v15  ;;  %v374_v20 = vrot.slane %v287_v16, %v602_v10  ;;  %v370_v21 = vrot.slane %v285_v17, %v604_v13 }
  0xef   :  { %238 = vst.msk [vmem:[#allocation2] sm:$0xff] %vm61_vm0, %v236_v19  ;;  %v375_v25 = vsel %vm156_vm1, %v374_v20, %v370_v21 }
  0xf0   :  { %v382_v26 = vsel %vm233_vm8, %v375_v25, %v381_v24 }
  0xf1   :  { %v384_v27 = vadd.f32 %v382_v26, %v239_v23 }
  0xf3   :  { %385 = vst.msk [vmem:[#allocation3] sm:$0xff] %vm61_vm0, %v384_v27 }
  0xf6   :  { %v390_v10 = vld [vmem:[#allocation2] sm:$0xff] }
  0xf7   :  { %v391_v29 = vmul.f32 %v390_v10, %v389_v28 }
  0xf9   :  { %392 = vst.msk [vmem:[#allocation10] sm:$0xff] %vm61_vm0, %v391_v29 }
  0xfa   :  { %506 = shalt.err (!%p503_p5)
}
  0xfb   :  { %405 = dma.vmem_to_hbm [thread:$0]  %s403_s2, 128, %s694_s3, [#allocation6]   ;;  %v393_v13 = vld [vmem:[#allocation3] sm:$0xff] }
  0xfc   :  { %v394_v30 = vmul.f32 %v393_v13, %v389_v28  ;;  %s515_s10 = scalar_lea.vmem %s413_s6, 128  ;;  %p520_p7 = scmp.lt.s32.totalorder %s413_s6, %s413_s6 }
  0xfd   :  { %p516_p6 = scmp.ne.s32.totalorder %s413_s6, %s515_s10  ;;  %p521_p8 = scmp.lt.s32.totalorder %s515_s10, %s515_s10 }
  0xfe   :  { %395 = vst.msk [vmem:[#allocation11] sm:$0xff] %vm61_vm0, %v394_v30 }
  0xff   :  { %p522_p9 = por %p521_p8, %p520_p7 }
 0x101   :  { %p523_p10 = pnand %p522_p9, %p516_p6 }
 0x103   :  { %526 = shalt.err (!%p523_p10)
}
 0x104   :  { %415 = dma.vmem_to_hbm [thread:$0]  %s413_s6, 128, %s695_s4, [#allocation12]  }
 0x105   :  { %539 = dma.done.wait [#allocation6], 128  }
 0x106   :  { %540 = vsyncadd [#allocation6], 4294967168 }
 0x107   :  { %541 = dma.done.wait [#allocation12], 128  }
 0x108   :  { %542 = vsyncadd [#allocation12], 4294967168 }
 0x109   :  { %422 = vsyncpa [#allocation5], 1 }
 0x10a   :  { %423 = vsyncpa [#allocation8], 1 }
 0x10b   :  { %424 = vsyncpa [#allocation6], 1 }
 0x10c   :  { %425 = vsyncpa [#allocation12], 1 }

</bundles_post_ra>
